<compile_context>
chip_gen: v5e
topology: v5e:2x2
jax: 0.10.0
libtpu: 0.0.40
codegen_flags: <defaults>
</compile_context>

<pallas_src>
import jax
import jax.numpy as jnp
from jax.experimental import pallas as pl
from jax.experimental.pallas import tpu as pltpu


def _proj_matmul_kernel(w_ref, x_ref, o_ref):
    # w_ref: (Cout, K)     K = 9*Cin   (3x3 taps folded into the contraction dim)
    # x_ref: (1, K, TN)    im2col columns for TN output pixels (TN on lanes)
    # o_ref: (1, Cout, TN) lane-dense output block (already NCHW-ordered)
    acc = jnp.dot(w_ref[...], x_ref[0], preferred_element_type=jnp.float32)
    o_ref[...] = acc[None].astype(o_ref.dtype)


def overlap_patch_embed(x_nchw, weight_oihw):
    """OverlapPatchEmbed forward: 3x3 conv, stride 1, pad 1, no bias.

    x_nchw:      (N, Cin, H, W)     (PyTorch NCHW input layout)
    weight_oihw: (Cout, Cin, 3, 3)  (nn.Conv2d weight layout)
    returns:     (N, Cout, H, W)
    """
    N, Cin, H, W = x_nchw.shape
    Cout, _, KH, KW = weight_oihw.shape
    K = KH * KW * Cin
    HW = H * W

    # --- wrapper-side staging (cheap: the input has only Cin channels) ------
    # Zero pad (as nn.Conv2d padding=1) and build the im2col slab:
    #   slab[n, (kh*KW + kw)*Cin + ci, h*W + w] = x_pad[n, ci, h+kh, w+kw]
    x_pad = jnp.pad(x_nchw, ((0, 0), (0, 0), (1, 1), (1, 1)))
    taps = [x_pad[:, :, kh:kh + H, kw:kw + W]
            for kh in range(KH) for kw in range(KW)]
    slab = jnp.stack(taps, axis=1).reshape(N, K, HW)

    # Weight with the taps folded into the contraction dim (matches slab order).
    w_flat = jnp.transpose(weight_oihw, (0, 2, 3, 1)).reshape(Cout, K)

    # --- spatial tile: largest of {1024,512,256,128} that divides H*W and
    #     leaves >= 2 blocks (keeps the output lane-dense while giving the
    #     grid enough depth to pipeline / shard across TensorCores). ---------
    TN = HW
    for cand in (1024, 512, 256, 128):
        if HW % cand == 0 and HW // cand >= 2:
            TN = cand
            break
    n_blocks = HW // TN

    out_flat = pl.pallas_call(
        _proj_matmul_kernel,
        out_shape=jax.ShapeDtypeStruct((N, Cout, HW), x_nchw.dtype),
        grid=(N, n_blocks),
        in_specs=[
            pl.BlockSpec((Cout, K), lambda n, j: (0, 0)),      # whole weight
            pl.BlockSpec((1, K, TN), lambda n, j: (n, 0, j)),  # im2col columns
        ],
        out_specs=pl.BlockSpec((1, Cout, TN), lambda n, j: (n, 0, j)),
        compiler_params=pltpu.CompilerParams(
            dimension_semantics=("parallel", "parallel")),
    )(w_flat, slab)

    # (N, Cout, H*W) is already NCHW-ordered: this reshape is free.
    return out_flat.reshape(N, Cout, H, W)


if __name__ == "__main__":
    # Module defaults: in_c=3, embed_dim=48, kernel 3x3, stride 1, pad 1, no bias.
    in_c, embed_dim = 3, 48
    N, H, W = 2, 16, 16

    key = jax.random.PRNGKey(0)
    kx, kw = jax.random.split(key)
    x = jax.random.normal(kx, (N, in_c, H, W), dtype=jnp.float32)
    # Deterministic synthetic Conv2d weight (OIHW), no bias.
    weight = (jax.random.normal(kw, (embed_dim, in_c, 3, 3), dtype=jnp.float32)
              * 0.1)

    out = jax.block_until_ready(overlap_patch_embed(x, weight))

    # Reference check against XLA's conv (NCHW, OIHW, stride 1, pad 1).
    ref = jax.lax.conv_general_dilated(
        x, weight, window_strides=(1, 1), padding=((1, 1), (1, 1)),
        dimension_numbers=("NCHW", "OIHW", "NCHW"))
    assert out.shape == (N, embed_dim, H, W)
    assert jnp.allclose(out, ref, atol=1e-4, rtol=1e-4), "mismatch vs reference conv"

    print("KERNEL_OK")
</pallas_src>

<mosaic_0001>
module attributes {stable_mosaic.version = 11 : i64} {
  func.func @_proj_matmul_kernel(%arg0: i32, %arg1: i32, %arg2: memref<48x27xf32, #tpu.memory_space<vmem>>, %arg3: memref<1x27x128xf32, #tpu.memory_space<vmem>>, %arg4: memref<1x48x128xf32, #tpu.memory_space<vmem>>) attributes {dimension_semantics = [#tpu.dimension_semantics<parallel>, #tpu.dimension_semantics<parallel>], iteration_bounds = array<i64: 2, 2>, scalar_prefetch = 0 : i64, scratch_operands = 0 : i64, tpu.core_type = #tpu.core_type<tc>, window_params = [{pipeline_mode = #tpu.pipeline_mode<synchronous>, transform_indices = @transform_0, window_bounds = array<i64: 48, 27>}, {transform_indices = @transform_1, window_bounds = array<i64: 1, 27, 128>}, {transform_indices = @transform_2, window_bounds = array<i64: 1, 48, 128>}]} {
    %c0 = arith.constant 0 : index
    %c0_0 = arith.constant 0 : index
    %0 = vector.load %arg2[%c0, %c0_0] : memref<48x27xf32, #tpu.memory_space<vmem>>, vector<48x27xf32>
    %c0_1 = arith.constant 0 : index
    %c0_2 = arith.constant 0 : index
    %c0_3 = arith.constant 0 : index
    %1 = vector.load %arg3[%c0_1, %c0_2, %c0_3] : memref<1x27x128xf32, #tpu.memory_space<vmem>>, vector<1x27x128xf32>
    %2 = vector.shape_cast %1 : vector<1x27x128xf32> to vector<27x128xf32>
    %cst = arith.constant dense<0.000000e+00> : vector<48x128xf32>
    %3 = tpu.matmul %0, %2, %cst {dimension_numbers = #tpu.dot_dimension_numbers<[1], [0], [0], [1], [0, 0, 1, 1], [], []>} : vector<48x27xf32>, vector<27x128xf32>, vector<48x128xf32> -> vector<48x128xf32>
    %4 = vector.shape_cast %3 : vector<48x128xf32> to vector<1x48x128xf32>
    %c0_4 = arith.constant 0 : index
    %c0_5 = arith.constant 0 : index
    %c0_6 = arith.constant 0 : index
    %5 = vector.load %arg4[%c0_4, %c0_5, %c0_6] : memref<1x48x128xf32, #tpu.memory_space<vmem>>, vector<1x48x128xf32>
    tpu.vector_store %arg4[%c0_4, %c0_5, %c0_6], %4 {strides = array<i32>} : memref<1x48x128xf32, #tpu.memory_space<vmem>>, vector<1x48x128xf32>,
    return
  }
  func.func @transform_0(%arg0: i32, %arg1: i32) -> (i32, i32) {
    %c0_i32 = arith.constant 0 : i32
    %c0_i32_0 = arith.constant 0 : i32
    %c0_i32_1 = arith.constant 0 : i32
    return %c0_i32, %c0_i32_0 : i32, i32
  }
  func.func @transform_1(%arg0: i32, %arg1: i32) -> (i32, i32, i32) {
    %c0_i32 = arith.constant 0 : i32
    %c0_i32_0 = arith.constant 0 : i32
    return %arg0, %c0_i32, %arg1 : i32, i32, i32
  }
  func.func @transform_2(%arg0: i32, %arg1: i32) -> (i32, i32, i32) {
    %c0_i32 = arith.constant 0 : i32
    %c0_i32_0 = arith.constant 0 : i32
    return %arg0, %c0_i32, %arg1 : i32, i32, i32
  }
}

</mosaic_0001>

<bundles_post_ra>
// kernel: tpu_custom_call.1
= control target key start
LH: loop header
LB: loop body
LE: loop exit
PB: predicated region body
PF: predicated region fallthrough
CT: control target
= control target key end

     0   :  { %7 = vsyncpa [#allocation4], 0  ;;  %s760_s0 = inlined_call_operand.vmem [shape: f32[48,27], index: 0, kind: input, shape index: {}]   ;;  %s761_s1 = inlined_call_operand.vmem [shape: f32[2,27,256], index: 1, kind: input, shape index: {}]   ;;  %s762_s2 = inlined_call_operand.hbm [shape: f32[2,48,256], index: 2, kind: output, shape index: {}]  }
   0x1   :  { %9 = vsyncpa [#allocation4 + $0x1], 0  ;;  %s602_s9 = smov 0   ;;  %s604_s10 = smov 0  }
   0x2   :  { %s606_s11 = smov 0   ;;  %s608_s12 = smov 0  }
   0x3   :  { %s610_s13 = smov 0   ;;  %s612_s14 = smov 0  }
   0x4   :  { %s614_s15 = smov 0   ;;  %s616_s16 = smov 0  }
   0x5 LB: > { %s381_s17 = sadd.s32 4294967295, %s582_s16   ;;  %s382_s18 = sadd.s32 4294967294, %s582_s16   ;;  %s582_s16 = sphi %s616_s16, %s15_s16   ;;  %s578_s15 = sphi %s614_s15, %s772_s15   ;;  %s574_s14 = sphi %s612_s14, %s771_s14   ;;  %s570_s13 = sphi %s610_s13, %s770_s13   ;;  %s566_s12 = sphi %s608_s12, %s769_s12   ;;  %s562_s11 = sphi %s606_s11, %s768_s11   ;;  %s558_s10 = sphi %s604_s10, %s767_s10   ;;  %s554_s9 = sphi %s602_s9, %s766_s9  }
   0x6   : > { %s24_s19 = sadd.s32 1, %s574_s14  ;;  %s27_s20 = sadd.s32 1, %s578_s15 }
   0x7   : > { %p25_p0 = scmp.ge.s32.totalorder %s24_s19, 2  ;;  %p64_p1 = scmp.ne.s32.totalorder %s562_s11, %s558_s10 }
   0x8   : > { %p65_p2 = scmp.eq.s32.totalorder %s582_s16, 0  ;;  %p96_p5 = scmp.eq.s32.totalorder %s381_s17, 3 }
   0x9   : > { %s774_s19 = smov (%p25_p0, %s24_s19), 0  ;;  %s776_s20 = smov (!%p25_p0, %s27_s20), %s578_s15 }
   0xa   : > { %s53_s21 = ssub.s32 %s574_s14, %s774_s19  ;;  %p654_p3 = por %p65_p2, %p64_p1 }
   0xb   : > { %p29_p4 = scmp.ge.s32.totalorder %s776_s20, 2  ;;  %p101_p6 = scmp.ne.s32.totalorder %s558_s10, %s554_s9 }
   0xc   : > { %p102_p7 = scmp.eq.s32.totalorder %s382_s18, 3  ;;  %p662_p8 = por %p96_p5, %p64_p1 }
   0xd   : > { %s778_s20 = smov (%p29_p4, %s776_s20), 0  ;;  %s57_s27 = sadd.s32 1, %s562_s11 }
   0xe   : > { %p666_p9 = por %p102_p7, %p101_p6  ;;  %s52_s25 = ssub.s32 %s578_s15, %s778_s20 }
   0xf   : > { %s54_s26 = sor.u32 %s53_s21, %s52_s25  ;;  %p384_p11 = scmp.ge.s32.totalorder %s582_s16, 4 }
  0x10   : > { %p55_p10 = scmp.eq.s32.totalorder %s54_s26, 0 }
  0x11   : > { %121 = sbr.rel (%p384_p11) target bundleno = 32 (0x20), region = 20 }
  0x12   : > { %s674_s28 = scalar_select %p55_p10, %s562_s11, %s57_s27  }
  0x16   : > { %124 = sbr.rel (!%p654_p3) target bundleno = 32 (0x20), region = 24  ;;  %s126_s29 = sand.u32 (%p654_p3), 1, %s562_s11  }
  0x17   : > { %s386_s30 = sshll.u32 (%p654_p3), %s578_s15, 3  ;;  %s385_s3 = sshll.u32 (%p654_p3), %s126_s29, 5 }
  0x18   : > { %s130_s4 = sadd.s32 (%p654_p3), %s574_s14, %s386_s30  ;;  %s128_s17 = scalar_lea.vmem (%p654_p3), [#allocation2], %s385_s3 }
  0x19   : > { %s387_s5 = sshll.u32 (%p654_p3), %s130_s4, 3 }
  0x1a   : > { %s132_s8 = scalar_lea.vmem (%p654_p3), %s761_s1, %s387_s5 }
  0x1b   : > { %v167_v0 = vld [vmem:[%s132_s8] sm:$0xff]  ;;  %v169_v1 = vld [vmem:[%s132_s8 + $0x10] sm:$0xff] }
  0x1c   : > { %v171_v2 = vld [vmem:[%s132_s8 + $0x20] sm:$0xff]  ;;  %168 = vst [vmem:[%s128_s17] sm:$0xff] %v167_v0  ;;  %v173_v3 = vld [vmem:[%s132_s8 + $0x30] sm:$0xff] }
  0x1d   : > { %170 = vst [vmem:[%s128_s17 + $0x8] sm:$0xff] %v169_v1 }
  0x1e   : > { %172 = vst [vmem:[%s128_s17 + $0x10] sm:$0xff] %v171_v2 }
  0x1f   : > { %174 = vst [vmem:[%s128_s17 + $0x18] sm:$0xff] %v173_v3 }
  0x20 PF: > { %p388_p12 = scmp.ge.s32.totalorder %s582_s16, 1  ;;  %p179_p13 = scmp.lt.s32.totalorder %s582_s16, 5 }
  0x22   : > { %p180_p0 = pnand %p388_p12, %p179_p13 }
  0x23   : > { %s688_s18 = sand.u32 (!%p180_p0), 1, %s558_s10   ;;  %s508_s17 = scalar_lea.hbm (!%p180_p0), %s762_s2, 192 }
  0x24   : > { %183 = sbr.rel (%p180_p0) target bundleno = 194 (0xc2), region = 62  ;;  %s389_s21 = sshll.u32 (!%p180_p0), %s688_s18, 5 }
  0x25   : > { %s188_s22 = scalar_lea.vmem (!%p180_p0), [#allocation2], %s389_s21  ;;  %s412_s21 = smul.u32 (!%p180_p0), 48, %s688_s18 }
  0x27   : > { %s206_s26 = scalar_lea.vmem (!%p180_p0), [#allocation3], %s412_s21 }
  0x28   : > { %s295_s4 = sshll.u32 (!%p180_p0), %s206_s26, 4  ;;  %s296_s4 = int_to_ptr.vmem [resolvable:$true] %s295_s4 }
  0x29   : > { %vm236_vm0 = vcmask 1042432   ;;  %v216_v4 = vld [vmem:[%s188_s22 + $0x18] sm:$0x7]  ;;  %v215_v5 = vld [vmem:[%s188_s22 + $0x10] sm:$0xff]  ;;  %v214_v6 = vld [vmem:[%s188_s22 + $0x8] sm:$0xff]  ;;  %vm217_vm1 = vcmask 220160  }
  0x2a   : > { %402 = vmatpush.msk.msra.mxu3 %vm236_vm0, %v216_v4  ;;  %400 = vmatpush.msk.msra.mxu1 %vm236_vm0, %v216_v4  ;;  %v213_v7 = vld [vmem:[%s188_s22] sm:$0xff]  ;;  %v208_v9 = vld [vmem:[%s760_s0 + $0x8] sm:$0xff]  ;;  %v210_v10 = vld [vmem:[%s760_s0 + $0x18] sm:$0xff]  ;;  %s413_s22 = smul.u32 12, %s570_s13 }
  0x2b   : > { %401 = vmatpush.msk.msra.mxu2 %vm236_vm0, %v216_v4  ;;  %390 = vmatpush.msk.msra.mxu0 %vm236_vm0, %v216_v4  ;;  %v211_v8 = vld [vmem:[%s760_s0 + $0x20] sm:$0xff]  ;;  %v212_v12 = vld [vmem:[%s760_s0 + $0x28] sm:$0xff]  ;;  %v209_v13 = vld [vmem:[%s760_s0 + $0x10] sm:$0xff] }
  0x2c   : > { %405 = vmatpush.msra.mxu3 %v215_v5  ;;  %403 = vmatpush.msra.mxu1 %v215_v5  ;;  %v207_v11 = vld [vmem:[%s760_s0] sm:$0xff]  ;;  %s292_s25 = sadd.s32 %s566_s12, %s413_s22  ;;  %s282_s12 = scalar_lea.sflag [#allocation4], %s688_s18 }
  0x2d   : > { %404 = vmatpush.msra.mxu2 %v215_v5  ;;  %253 = vmatpush.msra.mxu0 %v215_v5  ;;  %s397_s27 = sshll.u32 %s292_s25, 3 }
  0x2e   : > { %408 = vmatpush.msra.mxu3 %v214_v6  ;;  %406 = vmatpush.msra.mxu1 %v214_v6  ;;  %s294_s3 = scalar_lea.hbm %s762_s2, %s397_s27 }
  0x2f   : > { %407 = vmatpush.msra.mxu2 %v214_v6  ;;  %254 = vmatpush.msra.mxu0 %v214_v6  ;;  %s297_s13 = sshll.u32 %s294_s3, 4  ;;  %s298_s13 = int_to_ptr.hbm [resolvable:$true] %s297_s13 }
  0x30   : > { %411 = vmatpush.msra.mxu3 %v213_v7  ;;  %409 = vmatpush.msra.mxu1 %v213_v7  ;;  %s502_s5 = sshra.s32 %s298_s13, 4  ;;  %s503_s5 = int_to_ptr.hbm [resolvable:$true] %s502_s5 }
  0x31   : > { %395 = vmatmul.msk.f32.vlgmr.msra.gmra.mxu3 %vm217_vm1, %v211_v8  ;;  %392 = vmatmul.msk.f32.vlgmr.msra.gmra.mxu1 %vm217_vm1, %v208_v9  ;;  %s504_s6 = scalar_lea.hbm %s503_s5, 48  ;;  %p509_p4 = scmp.lt.s32.totalorder %s503_s5, %s762_s2 }
  0x32   : > { %410 = vmatpush.msra.mxu2 %v213_v7  ;;  %255 = vmatpush.msra.mxu0 %v213_v7  ;;  %p505_p1 = scmp.ne.s32.totalorder %s503_s5, %s504_s6  ;;  %p510_p5 = scmp.lt.s32.totalorder %s508_s17, %s504_s6 }
  0x33   : > { %394 = vmatmul.msk.f32.vlgmr.msra.gmra.mxu2 %vm217_vm1, %v210_v10  ;;  %391 = vmatmul.msk.f32.vlgmr.msra.gmra.mxu0 %vm217_vm1, %v207_v11 }
  0x34   : > { %p506_p2 = pnand %p505_p1, %p662_p8  ;;  %p511_p6 = por %p510_p5, %p509_p4 }
  0x36   : > { %p507_p3 = pneg %p506_p2 }
  0x38   : > { %p512_p7 = pnand %p511_p6, %p507_p3 }
  0x39   : > { %396 = vmatmul.msk.f32.gmra.mxu3 %vm217_vm1, %v212_v12  ;;  %393 = vmatmul.msk.f32.gmra.mxu1 %vm217_vm1, %v209_v13 }
  0xae   : > { %v260_v14 = vpop.f32.mrf.mxu1 }
  0xaf   : > { %276 = vst [vmem:[%s206_s26 + $0x8] sm:$0xff] %v260_v14 }
  0xb0   : > { %v257_v15 = vpop.f32.mrf.mxu0 }
  0xb1   : > { %275 = vst [vmem:[%s206_s26] sm:$0xff] %v257_v15 }
  0xb4   : > { %v269_v16 = vpop.f32.mrf.mxu3 }
  0xb5   : > { %279 = vst [vmem:[%s206_s26 + $0x20] sm:$0xff] %v269_v16 }
  0xb6   : > { %v263_v17 = vpop.f32.mrf.mxu1  ;;  %v266_v18 = vpop.f32.mrf.mxu2 }
  0xb7   : > { %277 = vst [vmem:[%s206_s26 + $0x10] sm:$0xff] %v263_v17 }
  0xb8   : > { %278 = vst [vmem:[%s206_s26 + $0x18] sm:$0xff] %v266_v18 }
  0xbc   : > { %v272_v19 = vpop.f32.mrf.mxu3 }
  0xbd   : > { %280 = vst [vmem:[%s206_s26 + $0x28] sm:$0xff] %v272_v19 }
  0xbe   : > { %515 = shalt.err (!%p512_p7)
}
  0xbf   : > { %s584_s18 = smov 128   ;;  %s585_s25 = smov 256  }
  0xc0   : > { %s586_s26 = smov 8  }
  0xc1   : > { %414 = dma.vmem_to_hbm [thread:$0]  (%p662_p8), %s296_s4, 768, %s298_s13, %s282_s12, %s584_s18, %s585_s25, %s586_s26  }
  0xc2 PF: > { %p420_p10 = scmp.ge.s32.totalorder %s582_s16, 2  ;;  %s312_s27 = sand.u32 1, %s554_s9  }
  0xc3   : > { %s313_s29 = scalar_lea.sflag [#allocation4], %s312_s27 }
  0xc4   : > { %p417_p11 = pnand %p420_p10, %p666_p9 }
  0xc6   : > { %p418_p12 = pneg %p417_p11 }
  0xc8   : > { %549 = dma.done.wait (%p418_p12), %s313_s29, 768  }
  0xc9   : > { %551 = vsyncadd (%p418_p12), %s313_s29, 4294966528  ;;  %s15_s16 = sadd.s32 1, %s582_s16   ;;  %s766_s9 = smov %s558_s10 }
  0xca   : > { %p12_p13 = scmp.ge.s32.totalorder %s15_s16, 6   ;;  %s767_s10 = smov %s562_s11 }
  0xcb   : > { %s768_s11 = smov %s674_s28  ;;  %s769_s12 = smov %s574_s14 }
  0xcc   : > { %s770_s13 = smov %s578_s15  ;;  %s771_s14 = smov %s774_s19 }
  0xcd   : > { %s772_s15 = smov %s778_s20  ;;  %14 = sbr.rel (!%p12_p13) target bundleno = 5 (0x5), region = 106 }
  0xd2   :  { %319 = vsyncpa [#allocation4], 1 }
  0xd3   :  { %321 = vsyncpa [#allocation4 + $0x1], 1 }

</bundles_post_ra>
